<compile_context>
chip_gen: v5e
topology: v5e:2x2
jax: 0.10.0
libtpu: 0.0.40
codegen_flags: <defaults>
</compile_context>

<pallas_src>
import numpy as np
import jax
import jax.numpy as jnp
from jax import lax
from jax.experimental import pallas as pl
from jax.experimental.pallas import tpu as pltpu

# label_mapping from the PyTorch module
LABEL_MAPPING = {1: 1, 2: 1, 3: 1, 4: 1, 5: 1, 6: 1, 7: 2, 8: 2, 9: 2,
                 10: 3, 11: 3, 12: 3, 13: 3, 14: 3, 15: 3, 16: 3, 17: 3,
                 18: 4, 19: 4, 20: 4, 21: 4, 22: 4, 23: 4}
NUM_CLASSES = 24
NUM_REGIONS = 5
REGION_PAD = 8          # 5 region rows padded to a full sublane group
SMOOTH = 1e-5           # nnUNet SoftDiceLoss default smooth
WEIGHT_CE = 1.0
WEIGHT_DICE = 1.0
WEIGHT_CBDICE = 0.0     # TODO(synk): SoftcbDiceLoss not implemented (see header)
LANES = 128


def _region_of(x):
    """Map integer labels 0..23 -> region ids 0..4 (remap_labels for c == 1)."""
    return jnp.where(x <= 0, 0,
           jnp.where(x <= 6, 1,
           jnp.where(x <= 9, 2,
           jnp.where(x <= 17, 3, 4)))).astype(jnp.int32)


def _region_remap_matrix():
    """(5, 24) 0/1 matrix with region_logits = M @ logits (reference only)."""
    m = np.zeros((NUM_REGIONS, NUM_CLASSES), dtype=np.float32)
    for old, new in LABEL_MAPPING.items():
        m[new, old] = 1.0
    return m


def _lane_fold(x):
    """Sum (rows, T) -> (rows, 128) by tree-adding the 128-lane columns.

    Pure vreg-aligned VPU adds: keeps the hot loop free of cross-lane (XLU)
    reductions and of narrow masked stores."""
    t = x.shape[-1]
    cols = [x[:, j * LANES:(j + 1) * LANES] for j in range(t // LANES)]
    while len(cols) > 1:
        nxt = [a + b for a, b in zip(cols[0::2], cols[1::2])]
        if len(cols) % 2:
            nxt.append(cols[-1])
        cols = nxt
    return cols[0]


def _loss_stats_kernel(logits_ref, tgt_ref, full_ref, region_ref, ce_ref):
    # Zero the per-batch-element accumulators on the first spatial tile.
    @pl.when(pl.program_id(1) == 0)
    def _():
        full_ref[...] = jnp.zeros_like(full_ref)
        region_ref[...] = jnp.zeros_like(region_ref)
        ce_ref[...] = jnp.zeros_like(ce_ref)

    logits = logits_ref[...].astype(jnp.float32)      # (24, T)  (bf16 input ok)
    labels = tgt_ref[...]                             # (1, T) int32
    tile = logits.shape[-1]

    def path_stats(lg, lab, n_valid):
        """Lane-dense softmax statistics for one classification head.

        Returns tp / probsum / count (each (nc, 128)) and the CE partial
        (1, 128).  fp / fn are derived in the epilogue as probsum - tp and
        count - tp, which removes two (nc, T) multiplies per head per tile."""
        nc = lg.shape[0]
        cls = lax.broadcasted_iota(jnp.int32, (nc, tile), 0)
        m = jnp.max(lg, axis=0, keepdims=True)
        e = jnp.exp(lg - m)
        if n_valid < nc:                               # zero the padding rows
            e = jnp.where(cls < n_valid, e, 0.0)
        s = jnp.sum(e, axis=0, keepdims=True)
        probs = e * pl.reciprocal(s, approx=True)      # softmax_helper_dim1
        onehot = cls == lab
        masked = jnp.where(onehot, probs, 0.0)
        p_lab = jnp.sum(masked, axis=0, keepdims=True)  # prob of the true class
        nll = -jnp.log(p_lab)                           # (1, T) CE terms
        return (_lane_fold(masked), _lane_fold(probs),
                _lane_fold(onehot.astype(jnp.float32)), _lane_fold(nll))

    # ---- full 24-class head -------------------------------------------------
    tp_f, ps_f, cnt_f, ce_f = path_stats(logits, labels, NUM_CLASSES)

    # ---- region 5-class head (remap_labels on the prediction) ---------------
    # region_logits[r] = sum_{c>0 : label_mapping[c] == r} logits[c]; rows 0 and
    # 5..7 stay zero.  The 0/1 selector is built from iotas (no constant buffer
    # and no extra kernel input) and the tiny (8,24)x(24,T) contraction runs on
    # the otherwise idle MXU in the natural (K-on-sublanes) layout.
    rrow = lax.broadcasted_iota(jnp.int32, (REGION_PAD, NUM_CLASSES), 0)
    ccol = lax.broadcasted_iota(jnp.int32, (REGION_PAD, NUM_CLASSES), 1)
    remap = ((_region_of(ccol) == rrow) & (ccol > 0)).astype(jnp.float32)
    region_logits = jnp.dot(remap, logits, preferred_element_type=jnp.float32)
    tp_r, ps_r, cnt_r, ce_r = path_stats(region_logits, _region_of(labels),
                                         NUM_REGIONS)

    full_ref[...] += jnp.concatenate([tp_f, ps_f, cnt_f], axis=0)    # (72, 128)
    region_ref[...] += jnp.concatenate([tp_r, ps_r, cnt_r], axis=0)  # (24, 128)
    ce_ref[...] += jnp.concatenate([ce_f, ce_r], axis=0)             # (2, 128)


def _pick_tile(s, cap):
    """Largest multiple of 128 that divides S and is <= cap."""
    assert s % LANES == 0, "flattened spatial size must be a multiple of 128"
    cap = max(LANES, (min(cap, s) // LANES) * LANES)
    for t in range(cap, 0, -LANES):
        if s % t == 0:
            return t
    return LANES


def region_dc_ce_loss(logits, target, *, tile=8192):
    """logits: (B, 24, S) float32 (or bfloat16, upcast in-kernel),
    target: (B, 1, S) int32.  Returns the scalar compound loss."""
    B, C, S = logits.shape
    assert C == NUM_CLASSES
    tile = _pick_tile(S, tile)            # 8192-voxel cap keeps v7x (64 MiB VMEM) happy
    n_tiles = S // tile

    full_p, region_p, ce_p = pl.pallas_call(
        _loss_stats_kernel,
        out_shape=(
            jax.ShapeDtypeStruct((B, 3 * NUM_CLASSES, LANES), jnp.float32),
            jax.ShapeDtypeStruct((B, 3 * REGION_PAD, LANES), jnp.float32),
            jax.ShapeDtypeStruct((B, 2, LANES), jnp.float32)),
        grid_spec=pltpu.PrefetchScalarGridSpec(
            num_scalar_prefetch=0,
            grid=(B, n_tiles),
            in_specs=[
                pl.BlockSpec((pl.Squeezed(), NUM_CLASSES, tile),
                             lambda b, t: (b, 0, t)),
                pl.BlockSpec((pl.Squeezed(), 1, tile),
                             lambda b, t: (b, 0, t)),
            ],
            out_specs=[
                pl.BlockSpec((pl.Squeezed(), 3 * NUM_CLASSES, LANES),
                             lambda b, t: (b, 0, 0)),
                pl.BlockSpec((pl.Squeezed(), 3 * REGION_PAD, LANES),
                             lambda b, t: (b, 0, 0)),
                pl.BlockSpec((pl.Squeezed(), 2, LANES),
                             lambda b, t: (b, 0, 0)),
            ]),
        compiler_params=pltpu.CompilerParams(
            dimension_semantics=("parallel", "arbitrary"),
            vmem_limit_bytes=40 * 1024 * 1024),
    )(logits, target)

    # ---- tiny plain-JAX epilogue on <100 scalars -----------------------------
    n_vox = B * S
    f = jnp.sum(full_p, axis=(0, 2))          # (72,)
    r = jnp.sum(region_p, axis=(0, 2))        # (24,)
    ce = jnp.sum(ce_p, axis=(0, 2))           # (2,)

    def soft_dice(tp, probsum, count):
        # nnUNet SoftDiceLoss: batch_dice=True, do_bg=False, smooth=SMOOTH.
        # fp = probsum - tp, fn = count - tp  =>  2tp + fp + fn = probsum + count.
        dc = (2.0 * tp + SMOOTH) / jnp.maximum(probsum + count + SMOOTH, 1e-8)
        return -jnp.mean(dc[1:])

    tp_f = f[:NUM_CLASSES]
    ps_f = f[NUM_CLASSES:2 * NUM_CLASSES]
    cnt_f = f[2 * NUM_CLASSES:]
    tp_r = r[:NUM_REGIONS]
    ps_r = r[REGION_PAD:REGION_PAD + NUM_REGIONS]
    cnt_r = r[2 * REGION_PAD:2 * REGION_PAD + NUM_REGIONS]

    dc_loss = soft_dice(tp_f, ps_f, cnt_f)
    region_dc_loss = soft_dice(tp_r, ps_r, cnt_r)
    ce_loss = ce[0] / n_vox
    region_ce_loss = ce[1] / n_vox

    cbdice_loss = 0.0  # TODO(synk): SoftcbDiceLoss not implemented (see header)

    region_result = WEIGHT_CE * region_ce_loss + WEIGHT_DICE * region_dc_loss
    target_result = (WEIGHT_CE * ce_loss + WEIGHT_DICE * dc_loss
                     + WEIGHT_CBDICE * cbdice_loss)
    return region_result * 0.2 + target_result * 0.8


def _reference(logits, target):
    """Pure-JAX reference of the same forward (validation only)."""
    B, C, S = logits.shape
    remap = jnp.asarray(_region_remap_matrix())
    rlogits = jnp.einsum('rc,bcs->brs', remap, logits)
    tgt = target[:, 0]
    rtgt = _region_of(tgt)

    def dice_and_ce(lg, labels, nc):
        logp = jax.nn.log_softmax(lg, axis=1)
        probs = jnp.exp(logp)
        onehot = jax.nn.one_hot(labels, nc, axis=1, dtype=jnp.float32)
        ce = -jnp.mean(jnp.sum(onehot * logp, axis=1))
        tp = jnp.sum(probs * onehot, axis=(0, 2))
        fp = jnp.sum(probs * (1.0 - onehot), axis=(0, 2))
        fn = jnp.sum((1.0 - probs) * onehot, axis=(0, 2))
        dc = (2 * tp + SMOOTH) / jnp.maximum(2 * tp + fp + fn + SMOOTH, 1e-8)
        return -jnp.mean(dc[1:]), ce

    dc, ce = dice_and_ce(logits, tgt, C)
    rdc, rce = dice_and_ce(rlogits, rtgt, NUM_REGIONS)
    return 0.2 * (WEIGHT_CE * rce + WEIGHT_DICE * rdc) + \
           0.8 * (WEIGHT_CE * ce + WEIGHT_DICE * dc)


if __name__ == "__main__":
    key = jax.random.PRNGKey(0)
    k1, k2 = jax.random.split(key)
    B, C, X, Y, Z = 2, 24, 8, 8, 8                      # small 3D segmentation case
    net_output = jax.random.normal(k1, (B, C, X, Y, Z), dtype=jnp.float32)
    target = jax.random.randint(k2, (B, 1, X, Y, Z), 0, C, dtype=jnp.int32)

    # glue: flatten spatial dims (NCDHW -> (B, C, S))
    logits_flat = net_output.reshape(B, C, -1)
    target_flat = target.reshape(B, 1, -1)

    loss = region_dc_ce_loss(logits_flat, target_flat)
    loss = jax.block_until_ready(loss)

    ref = jax.block_until_ready(_reference(logits_flat, target_flat))
    assert jnp.allclose(loss, ref, rtol=2e-3, atol=1e-3), (float(loss), float(ref))

    print("KERNEL_OK")
</pallas_src>

<mosaic_0001>
module attributes {stable_mosaic.version = 11 : i64} {
  func.func @_loss_stats_kernel(%arg0: i32, %arg1: i32, %arg2: memref<1x24x512xf32, #tpu.memory_space<vmem>>, %arg3: memref<1x1x512xi32, #tpu.memory_space<vmem>>, %arg4: memref<1x72x128xf32, #tpu.memory_space<vmem>>, %arg5: memref<1x24x128xf32, #tpu.memory_space<vmem>>, %arg6: memref<1x2x128xf32, #tpu.memory_space<vmem>>) attributes {dimension_semantics = [#tpu.dimension_semantics<parallel>, #tpu.dimension_semantics<arbitrary>], iteration_bounds = array<i64: 2, 1>, scalar_prefetch = 0 : i64, scratch_operands = 0 : i64, tpu.core_type = #tpu.core_type<tc>, window_params = [{transform_indices = @transform_0, window_bounds = array<i64: 1, 24, 512>}, {transform_indices = @transform_1, window_bounds = array<i64: 1, 1, 512>}, {transform_indices = @transform_2, window_bounds = array<i64: 1, 72, 128>}, {transform_indices = @transform_3, window_bounds = array<i64: 1, 24, 128>}, {transform_indices = @transform_4, window_bounds = array<i64: 1, 2, 128>}]} {
    %c0_i32 = arith.constant 0 : i32
    %0 = arith.cmpi eq, %arg1, %c0_i32 : i32
    %1 = arith.extui %0 : i1 to i32
    %c0_i32_0 = arith.constant 0 : i32
    %2 = arith.cmpi ne, %1, %c0_i32_0 : i32
    scf.if %2 {
      %cst_47 = arith.constant 0.000000e+00 : f32
      %175 = vector.broadcast %cst_47 : f32 to vector<72x128xf32>
      %c0_48 = arith.constant 0 : index
      %c0_49 = arith.constant 0 : index
      %c0_50 = arith.constant 0 : index
      %176 = vector.load %arg4[%c0_48, %c0_49, %c0_50] : memref<1x72x128xf32, #tpu.memory_space<vmem>>, vector<1x72x128xf32>
      %177 = vector.shape_cast %176 : vector<1x72x128xf32> to vector<72x128xf32>
      %178 = vector.shape_cast %175 : vector<72x128xf32> to vector<1x72x128xf32>
      tpu.vector_store %arg4[%c0_48, %c0_49, %c0_50], %178 {strides = array<i32>} : memref<1x72x128xf32, #tpu.memory_space<vmem>>, vector<1x72x128xf32>,
      %cst_51 = arith.constant 0.000000e+00 : f32
      %179 = vector.broadcast %cst_51 : f32 to vector<24x128xf32>
      %c0_52 = arith.constant 0 : index
      %c0_53 = arith.constant 0 : index
      %c0_54 = arith.constant 0 : index
      %180 = vector.load %arg5[%c0_52, %c0_53, %c0_54] : memref<1x24x128xf32, #tpu.memory_space<vmem>>, vector<1x24x128xf32>
      %181 = vector.shape_cast %180 : vector<1x24x128xf32> to vector<24x128xf32>
      %182 = vector.shape_cast %179 : vector<24x128xf32> to vector<1x24x128xf32>
      tpu.vector_store %arg5[%c0_52, %c0_53, %c0_54], %182 {strides = array<i32>} : memref<1x24x128xf32, #tpu.memory_space<vmem>>, vector<1x24x128xf32>,
      %cst_55 = arith.constant 0.000000e+00 : f32
      %183 = vector.broadcast %cst_55 : f32 to vector<2x128xf32>
      %c0_56 = arith.constant 0 : index
      %c0_57 = arith.constant 0 : index
      %c0_58 = arith.constant 0 : index
      %184 = vector.load %arg6[%c0_56, %c0_57, %c0_58] : memref<1x2x128xf32, #tpu.memory_space<vmem>>, vector<1x2x128xf32>
      %185 = vector.shape_cast %184 : vector<1x2x128xf32> to vector<2x128xf32>
      %186 = vector.shape_cast %183 : vector<2x128xf32> to vector<1x2x128xf32>
      tpu.vector_store %arg6[%c0_56, %c0_57, %c0_58], %186 {strides = array<i32>} : memref<1x2x128xf32, #tpu.memory_space<vmem>>, vector<1x2x128xf32>,
    } else {
    }
    %c0 = arith.constant 0 : index
    %c0_1 = arith.constant 0 : index
    %c0_2 = arith.constant 0 : index
    %3 = vector.load %arg2[%c0, %c0_1, %c0_2] : memref<1x24x512xf32, #tpu.memory_space<vmem>>, vector<1x24x512xf32>
    %4 = vector.shape_cast %3 : vector<1x24x512xf32> to vector<24x512xf32>
    %c0_3 = arith.constant 0 : index
    %c0_4 = arith.constant 0 : index
    %c0_5 = arith.constant 0 : index
    %5 = vector.load %arg3[%c0_3, %c0_4, %c0_5] : memref<1x1x512xi32, #tpu.memory_space<vmem>>, vector<1x1x512xi32>
    %6 = vector.shape_cast %5 : vector<1x1x512xi32> to vector<1x512xi32>
    %7 = tpu.iota {dimensions = array<i32: 0>} : vector<24x512xi32>
    %cst = arith.constant dense<0xFF800000> : vector<512xf32>
    %8 = vector.multi_reduction <maximumf>, %4, %cst [0] : vector<24x512xf32> to vector<512xf32>
    %9 = vector.shape_cast %8 : vector<512xf32> to vector<1x512xf32>
    %10 = vector.broadcast %9 : vector<1x512xf32> to vector<24x512xf32>
    %11 = arith.subf %4, %10 : vector<24x512xf32>
    %12 = math.exp %11 : vector<24x512xf32>
    %cst_6 = arith.constant dense<0.000000e+00> : vector<512xf32>
    %13 = vector.multi_reduction <add>, %12, %cst_6 [0] : vector<24x512xf32> to vector<512xf32>
    %14 = vector.shape_cast %13 : vector<512xf32> to vector<1x512xf32>
    %15 = tpu.reciprocal %14 {approx = true} : vector<1x512xf32> -> vector<1x512xf32>
    %16 = vector.broadcast %15 : vector<1x512xf32> to vector<24x512xf32>
    %17 = arith.mulf %12, %16 : vector<24x512xf32>
    %18 = vector.broadcast %6 : vector<1x512xi32> to vector<24x512xi32>
    %19 = arith.cmpi eq, %7, %18 : vector<24x512xi32>
    %cst_7 = arith.constant 0.000000e+00 : f32
    %20 = vector.broadcast %cst_7 : f32 to vector<24x512xf32>
    %21 = arith.select %19, %17, %20 : vector<24x512xi1>, vector<24x512xf32>
    %cst_8 = arith.constant dense<0.000000e+00> : vector<512xf32>
    %22 = vector.multi_reduction <add>, %21, %cst_8 [0] : vector<24x512xf32> to vector<512xf32>
    %23 = vector.shape_cast %22 : vector<512xf32> to vector<1x512xf32>
    %24 = math.log %23 : vector<1x512xf32>
    %cst_9 = arith.constant 0.000000e+00 : f32
    %25 = vector.broadcast %cst_9 : f32 to vector<1x512xf32>
    %26 = arith.subf %25, %24 : vector<1x512xf32>
    %27 = vector.extract_strided_slice %21 {offsets = [0, 0], sizes = [24, 128], strides = [1, 1]} : vector<24x512xf32> to vector<24x128xf32>
    %28 = vector.extract_strided_slice %21 {offsets = [0, 128], sizes = [24, 128], strides = [1, 1]} : vector<24x512xf32> to vector<24x128xf32>
    %29 = vector.extract_strided_slice %21 {offsets = [0, 256], sizes = [24, 128], strides = [1, 1]} : vector<24x512xf32> to vector<24x128xf32>
    %30 = vector.extract_strided_slice %21 {offsets = [0, 384], sizes = [24, 128], strides = [1, 1]} : vector<24x512xf32> to vector<24x128xf32>
    %31 = arith.addf %27, %28 : vector<24x128xf32>
    %32 = arith.addf %29, %30 : vector<24x128xf32>
    %33 = arith.addf %31, %32 : vector<24x128xf32>
    %34 = vector.extract_strided_slice %17 {offsets = [0, 0], sizes = [24, 128], strides = [1, 1]} : vector<24x512xf32> to vector<24x128xf32>
    %35 = vector.extract_strided_slice %17 {offsets = [0, 128], sizes = [24, 128], strides = [1, 1]} : vector<24x512xf32> to vector<24x128xf32>
    %36 = vector.extract_strided_slice %17 {offsets = [0, 256], sizes = [24, 128], strides = [1, 1]} : vector<24x512xf32> to vector<24x128xf32>
    %37 = vector.extract_strided_slice %17 {offsets = [0, 384], sizes = [24, 128], strides = [1, 1]} : vector<24x512xf32> to vector<24x128xf32>
    %38 = arith.addf %34, %35 : vector<24x128xf32>
    %39 = arith.addf %36, %37 : vector<24x128xf32>
    %40 = arith.addf %38, %39 : vector<24x128xf32>
    %41 = arith.extui %19 : vector<24x512xi1> to vector<24x512xi32>
    %42 = arith.sitofp %41 : vector<24x512xi32> to vector<24x512xf32>
    %43 = vector.extract_strided_slice %42 {offsets = [0, 0], sizes = [24, 128], strides = [1, 1]} : vector<24x512xf32> to vector<24x128xf32>
    %44 = vector.extract_strided_slice %42 {offsets = [0, 128], sizes = [24, 128], strides = [1, 1]} : vector<24x512xf32> to vector<24x128xf32>
    %45 = vector.extract_strided_slice %42 {offsets = [0, 256], sizes = [24, 128], strides = [1, 1]} : vector<24x512xf32> to vector<24x128xf32>
    %46 = vector.extract_strided_slice %42 {offsets = [0, 384], sizes = [24, 128], strides = [1, 1]} : vector<24x512xf32> to vector<24x128xf32>
    %47 = arith.addf %43, %44 : vector<24x128xf32>
    %48 = arith.addf %45, %46 : vector<24x128xf32>
    %49 = arith.addf %47, %48 : vector<24x128xf32>
    %50 = vector.extract_strided_slice %26 {offsets = [0, 0], sizes = [1, 128], strides = [1, 1]} : vector<1x512xf32> to vector<1x128xf32>
    %51 = vector.extract_strided_slice %26 {offsets = [0, 128], sizes = [1, 128], strides = [1, 1]} : vector<1x512xf32> to vector<1x128xf32>
    %52 = vector.extract_strided_slice %26 {offsets = [0, 256], sizes = [1, 128], strides = [1, 1]} : vector<1x512xf32> to vector<1x128xf32>
    %53 = vector.extract_strided_slice %26 {offsets = [0, 384], sizes = [1, 128], strides = [1, 1]} : vector<1x512xf32> to vector<1x128xf32>
    %54 = arith.addf %50, %51 : vector<1x128xf32>
    %55 = arith.addf %52, %53 : vector<1x128xf32>
    %56 = arith.addf %54, %55 : vector<1x128xf32>
    %57 = tpu.iota {dimensions = array<i32: 0>} : vector<8x24xi32>
    %58 = tpu.iota {dimensions = array<i32: 1>} : vector<8x24xi32>
    %c0_i32_10 = arith.constant 0 : i32
    %59 = vector.broadcast %c0_i32_10 : i32 to vector<8x24xi32>
    %60 = arith.cmpi sle, %58, %59 : vector<8x24xi32>
    %c6_i32 = arith.constant 6 : i32
    %61 = vector.broadcast %c6_i32 : i32 to vector<8x24xi32>
    %62 = arith.cmpi sle, %58, %61 : vector<8x24xi32>
    %c9_i32 = arith.constant 9 : i32
    %63 = vector.broadcast %c9_i32 : i32 to vector<8x24xi32>
    %64 = arith.cmpi sle, %58, %63 : vector<8x24xi32>
    %c17_i32 = arith.constant 17 : i32
    %65 = vector.broadcast %c17_i32 : i32 to vector<8x24xi32>
    %66 = arith.cmpi sle, %58, %65 : vector<8x24xi32>
    %c3_i32 = arith.constant 3 : i32
    %c4_i32 = arith.constant 4 : i32
    %67 = vector.broadcast %c3_i32 : i32 to vector<8x24xi32>
    %68 = vector.broadcast %c4_i32 : i32 to vector<8x24xi32>
    %69 = arith.select %66, %67, %68 : vector<8x24xi1>, vector<8x24xi32>
    %c2_i32 = arith.constant 2 : i32
    %70 = vector.broadcast %c2_i32 : i32 to vector<8x24xi32>
    %71 = arith.select %64, %70, %69 : vector<8x24xi1>, vector<8x24xi32>
    %c1_i32 = arith.constant 1 : i32
    %72 = vector.broadcast %c1_i32 : i32 to vector<8x24xi32>
    %73 = arith.select %62, %72, %71 : vector<8x24xi1>, vector<8x24xi32>
    %c0_i32_11 = arith.constant 0 : i32
    %74 = vector.broadcast %c0_i32_11 : i32 to vector<8x24xi32>
    %75 = arith.select %60, %74, %73 : vector<8x24xi1>, vector<8x24xi32>
    %76 = arith.cmpi eq, %75, %57 : vector<8x24xi32>
    %c0_i32_12 = arith.constant 0 : i32
    %77 = vector.broadcast %c0_i32_12 : i32 to vector<8x24xi32>
    %78 = arith.cmpi sgt, %58, %77 : vector<8x24xi32>
    %79 = arith.andi %76, %78 : vector<8x24xi1>
    %80 = arith.extui %79 : vector<8x24xi1> to vector<8x24xi32>
    %81 = arith.sitofp %80 : vector<8x24xi32> to vector<8x24xf32>
    %cst_13 = arith.constant dense<0.000000e+00> : vector<8x512xf32>
    %82 = tpu.matmul %81, %4, %cst_13 {dimension_numbers = #tpu.dot_dimension_numbers<[1], [0], [0], [1], [0, 0, 1, 1], [], []>} : vector<8x24xf32>, vector<24x512xf32>, vector<8x512xf32> -> vector<8x512xf32>
    %c0_i32_14 = arith.constant 0 : i32
    %83 = vector.broadcast %c0_i32_14 : i32 to vector<1x512xi32>
    %84 = arith.cmpi sle, %6, %83 : vector<1x512xi32>
    %c6_i32_15 = arith.constant 6 : i32
    %85 = vector.broadcast %c6_i32_15 : i32 to vector<1x512xi32>
    %86 = arith.cmpi sle, %6, %85 : vector<1x512xi32>
    %c9_i32_16 = arith.constant 9 : i32
    %87 = vector.broadcast %c9_i32_16 : i32 to vector<1x512xi32>
    %88 = arith.cmpi sle, %6, %87 : vector<1x512xi32>
    %c17_i32_17 = arith.constant 17 : i32
    %89 = vector.broadcast %c17_i32_17 : i32 to vector<1x512xi32>
    %90 = arith.cmpi sle, %6, %89 : vector<1x512xi32>
    %c3_i32_18 = arith.constant 3 : i32
    %c4_i32_19 = arith.constant 4 : i32
    %91 = vector.broadcast %c3_i32_18 : i32 to vector<1x512xi32>
    %92 = vector.broadcast %c4_i32_19 : i32 to vector<1x512xi32>
    %93 = arith.select %90, %91, %92 : vector<1x512xi1>, vector<1x512xi32>
    %c2_i32_20 = arith.constant 2 : i32
    %94 = vector.broadcast %c2_i32_20 : i32 to vector<1x512xi32>
    %95 = arith.select %88, %94, %93 : vector<1x512xi1>, vector<1x512xi32>
    %c1_i32_21 = arith.constant 1 : i32
    %96 = vector.broadcast %c1_i32_21 : i32 to vector<1x512xi32>
    %97 = arith.select %86, %96, %95 : vector<1x512xi1>, vector<1x512xi32>
    %c0_i32_22 = arith.constant 0 : i32
    %98 = vector.broadcast %c0_i32_22 : i32 to vector<1x512xi32>
    %99 = arith.select %84, %98, %97 : vector<1x512xi1>, vector<1x512xi32>
    %100 = tpu.iota {dimensions = array<i32: 0>} : vector<8x512xi32>
    %cst_23 = arith.constant dense<0xFF800000> : vector<512xf32>
    %101 = vector.multi_reduction <maximumf>, %82, %cst_23 [0] : vector<8x512xf32> to vector<512xf32>
    %102 = vector.shape_cast %101 : vector<512xf32> to vector<1x512xf32>
    %103 = vector.broadcast %102 : vector<1x512xf32> to vector<8x512xf32>
    %104 = arith.subf %82, %103 : vector<8x512xf32>
    %105 = math.exp %104 : vector<8x512xf32>
    %c5_i32 = arith.constant 5 : i32
    %106 = vector.broadcast %c5_i32 : i32 to vector<8x512xi32>
    %107 = arith.cmpi slt, %100, %106 : vector<8x512xi32>
    %cst_24 = arith.constant 0.000000e+00 : f32
    %108 = vector.broadcast %cst_24 : f32 to vector<8x512xf32>
    %109 = arith.select %107, %105, %108 : vector<8x512xi1>, vector<8x512xf32>
    %cst_25 = arith.constant dense<0.000000e+00> : vector<512xf32>
    %110 = vector.multi_reduction <add>, %109, %cst_25 [0] : vector<8x512xf32> to vector<512xf32>
    %111 = vector.shape_cast %110 : vector<512xf32> to vector<1x512xf32>
    %112 = tpu.reciprocal %111 {approx = true} : vector<1x512xf32> -> vector<1x512xf32>
    %113 = vector.broadcast %112 : vector<1x512xf32> to vector<8x512xf32>
    %114 = arith.mulf %109, %113 : vector<8x512xf32>
    %115 = vector.broadcast %99 : vector<1x512xi32> to vector<8x512xi32>
    %116 = arith.cmpi eq, %100, %115 : vector<8x512xi32>
    %cst_26 = arith.constant 0.000000e+00 : f32
    %117 = vector.broadcast %cst_26 : f32 to vector<8x512xf32>
    %118 = arith.select %116, %114, %117 : vector<8x512xi1>, vector<8x512xf32>
    %cst_27 = arith.constant dense<0.000000e+00> : vector<512xf32>
    %119 = vector.multi_reduction <add>, %118, %cst_27 [0] : vector<8x512xf32> to vector<512xf32>
    %120 = vector.shape_cast %119 : vector<512xf32> to vector<1x512xf32>
    %121 = math.log %120 : vector<1x512xf32>
    %cst_28 = arith.constant 0.000000e+00 : f32
    %122 = vector.broadcast %cst_28 : f32 to vector<1x512xf32>
    %123 = arith.subf %122, %121 : vector<1x512xf32>
    %124 = vector.extract_strided_slice %118 {offsets = [0, 0], sizes = [8, 128], strides = [1, 1]} : vector<8x512xf32> to vector<8x128xf32>
    %125 = vector.extract_strided_slice %118 {offsets = [0, 128], sizes = [8, 128], strides = [1, 1]} : vector<8x512xf32> to vector<8x128xf32>
    %126 = vector.extract_strided_slice %118 {offsets = [0, 256], sizes = [8, 128], strides = [1, 1]} : vector<8x512xf32> to vector<8x128xf32>
    %127 = vector.extract_strided_slice %118 {offsets = [0, 384], sizes = [8, 128], strides = [1, 1]} : vector<8x512xf32> to vector<8x128xf32>
    %128 = arith.addf %124, %125 : vector<8x128xf32>
    %129 = arith.addf %126, %127 : vector<8x128xf32>
    %130 = arith.addf %128, %129 : vector<8x128xf32>
    %131 = vector.extract_strided_slice %114 {offsets = [0, 0], sizes = [8, 128], strides = [1, 1]} : vector<8x512xf32> to vector<8x128xf32>
    %132 = vector.extract_strided_slice %114 {offsets = [0, 128], sizes = [8, 128], strides = [1, 1]} : vector<8x512xf32> to vector<8x128xf32>
    %133 = vector.extract_strided_slice %114 {offsets = [0, 256], sizes = [8, 128], strides = [1, 1]} : vector<8x512xf32> to vector<8x128xf32>
    %134 = vector.extract_strided_slice %114 {offsets = [0, 384], sizes = [8, 128], strides = [1, 1]} : vector<8x512xf32> to vector<8x128xf32>
    %135 = arith.addf %131, %132 : vector<8x128xf32>
    %136 = arith.addf %133, %134 : vector<8x128xf32>
    %137 = arith.addf %135, %136 : vector<8x128xf32>
    %138 = arith.extui %116 : vector<8x512xi1> to vector<8x512xi32>
    %139 = arith.sitofp %138 : vector<8x512xi32> to vector<8x512xf32>
    %140 = vector.extract_strided_slice %139 {offsets = [0, 0], sizes = [8, 128], strides = [1, 1]} : vector<8x512xf32> to vector<8x128xf32>
    %141 = vector.extract_strided_slice %139 {offsets = [0, 128], sizes = [8, 128], strides = [1, 1]} : vector<8x512xf32> to vector<8x128xf32>
    %142 = vector.extract_strided_slice %139 {offsets = [0, 256], sizes = [8, 128], strides = [1, 1]} : vector<8x512xf32> to vector<8x128xf32>
    %143 = vector.extract_strided_slice %139 {offsets = [0, 384], sizes = [8, 128], strides = [1, 1]} : vector<8x512xf32> to vector<8x128xf32>
    %144 = arith.addf %140, %141 : vector<8x128xf32>
    %145 = arith.addf %142, %143 : vector<8x128xf32>
    %146 = arith.addf %144, %145 : vector<8x128xf32>
    %147 = vector.extract_strided_slice %123 {offsets = [0, 0], sizes = [1, 128], strides = [1, 1]} : vector<1x512xf32> to vector<1x128xf32>
    %148 = vector.extract_strided_slice %123 {offsets = [0, 128], sizes = [1, 128], strides = [1, 1]} : vector<1x512xf32> to vector<1x128xf32>
    %149 = vector.extract_strided_slice %123 {offsets = [0, 256], sizes = [1, 128], strides = [1, 1]} : vector<1x512xf32> to vector<1x128xf32>
    %150 = vector.extract_strided_slice %123 {offsets = [0, 384], sizes = [1, 128], strides = [1, 1]} : vector<1x512xf32> to vector<1x128xf32>
    %151 = arith.addf %147, %148 : vector<1x128xf32>
    %152 = arith.addf %149, %150 : vector<1x128xf32>
    %153 = arith.addf %151, %152 : vector<1x128xf32>
    %c0_29 = arith.constant 0 : index
    %c0_30 = arith.constant 0 : index
    %c0_31 = arith.constant 0 : index
    %154 = vector.load %arg4[%c0_29, %c0_30, %c0_31] : memref<1x72x128xf32, #tpu.memory_space<vmem>>, vector<1x72x128xf32>
    %155 = vector.shape_cast %154 : vector<1x72x128xf32> to vector<72x128xf32>
    %156 = tpu.concatenate %33, %40, %49 in 0 : vector<24x128xf32>, vector<24x128xf32>, vector<24x128xf32> -> vector<72x128xf32>
    %157 = arith.addf %155, %156 : vector<72x128xf32>
    %c0_32 = arith.constant 0 : index
    %c0_33 = arith.constant 0 : index
    %c0_34 = arith.constant 0 : index
    %158 = vector.load %arg4[%c0_32, %c0_33, %c0_34] : memref<1x72x128xf32, #tpu.memory_space<vmem>>, vector<1x72x128xf32>
    %159 = vector.shape_cast %158 : vector<1x72x128xf32> to vector<72x128xf32>
    %160 = vector.shape_cast %157 : vector<72x128xf32> to vector<1x72x128xf32>
    tpu.vector_store %arg4[%c0_32, %c0_33, %c0_34], %160 {strides = array<i32>} : memref<1x72x128xf32, #tpu.memory_space<vmem>>, vector<1x72x128xf32>,
    %c0_35 = arith.constant 0 : index
    %c0_36 = arith.constant 0 : index
    %c0_37 = arith.constant 0 : index
    %161 = vector.load %arg5[%c0_35, %c0_36, %c0_37] : memref<1x24x128xf32, #tpu.memory_space<vmem>>, vector<1x24x128xf32>
    %162 = vector.shape_cast %161 : vector<1x24x128xf32> to vector<24x128xf32>
    %163 = tpu.concatenate %130, %137, %146 in 0 : vector<8x128xf32>, vector<8x128xf32>, vector<8x128xf32> -> vector<24x128xf32>
    %164 = arith.addf %162, %163 : vector<24x128xf32>
    %c0_38 = arith.constant 0 : index
    %c0_39 = arith.constant 0 : index
    %c0_40 = arith.constant 0 : index
    %165 = vector.load %arg5[%c0_38, %c0_39, %c0_40] : memref<1x24x128xf32, #tpu.memory_space<vmem>>, vector<1x24x128xf32>
    %166 = vector.shape_cast %165 : vector<1x24x128xf32> to vector<24x128xf32>
    %167 = vector.shape_cast %164 : vector<24x128xf32> to vector<1x24x128xf32>
    tpu.vector_store %arg5[%c0_38, %c0_39, %c0_40], %167 {strides = array<i32>} : memref<1x24x128xf32, #tpu.memory_space<vmem>>, vector<1x24x128xf32>,
    %c0_41 = arith.constant 0 : index
    %c0_42 = arith.constant 0 : index
    %c0_43 = arith.constant 0 : index
    %168 = vector.load %arg6[%c0_41, %c0_42, %c0_43] : memref<1x2x128xf32, #tpu.memory_space<vmem>>, vector<1x2x128xf32>
    %169 = vector.shape_cast %168 : vector<1x2x128xf32> to vector<2x128xf32>
    %170 = tpu.concatenate %56, %153 in 0 : vector<1x128xf32>, vector<1x128xf32> -> vector<2x128xf32>
    %171 = arith.addf %169, %170 : vector<2x128xf32>
    %c0_44 = arith.constant 0 : index
    %c0_45 = arith.constant 0 : index
    %c0_46 = arith.constant 0 : index
    %172 = vector.load %arg6[%c0_44, %c0_45, %c0_46] : memref<1x2x128xf32, #tpu.memory_space<vmem>>, vector<1x2x128xf32>
    %173 = vector.shape_cast %172 : vector<1x2x128xf32> to vector<2x128xf32>
    %174 = vector.shape_cast %171 : vector<2x128xf32> to vector<1x2x128xf32>
    tpu.vector_store %arg6[%c0_44, %c0_45, %c0_46], %174 {strides = array<i32>} : memref<1x2x128xf32, #tpu.memory_space<vmem>>, vector<1x2x128xf32>,
    return
  }
  func.func @transform_0(%arg0: i32, %arg1: i32) -> (i32, i32, i32) {
    %c0_i32 = arith.constant 0 : i32
    %c0_i32_0 = arith.constant 0 : i32
    return %arg0, %c0_i32, %arg1 : i32, i32, i32
  }
  func.func @transform_1(%arg0: i32, %arg1: i32) -> (i32, i32, i32) {
    %c0_i32 = arith.constant 0 : i32
    %c0_i32_0 = arith.constant 0 : i32
    return %arg0, %c0_i32, %arg1 : i32, i32, i32
  }
  func.func @transform_2(%arg0: i32, %arg1: i32) -> (i32, i32, i32) {
    %c0_i32 = arith.constant 0 : i32
    %c0_i32_0 = arith.constant 0 : i32
    %c0_i32_1 = arith.constant 0 : i32
    return %arg0, %c0_i32, %c0_i32_0 : i32, i32, i32
  }
  func.func @transform_3(%arg0: i32, %arg1: i32) -> (i32, i32, i32) {
    %c0_i32 = arith.constant 0 : i32
    %c0_i32_0 = arith.constant 0 : i32
    %c0_i32_1 = arith.constant 0 : i32
    return %arg0, %c0_i32, %c0_i32_0 : i32, i32, i32
  }
  func.func @transform_4(%arg0: i32, %arg1: i32) -> (i32, i32, i32) {
    %c0_i32 = arith.constant 0 : i32
    %c0_i32_0 = arith.constant 0 : i32
    %c0_i32_1 = arith.constant 0 : i32
    return %arg0, %c0_i32, %c0_i32_0 : i32, i32, i32
  }
}

</mosaic_0001>

<bundles_post_ra>
// kernel: tpu_custom_call.1
= control target key start
LH: loop header
LB: loop body
LE: loop exit
PB: predicated region body
PF: predicated region fallthrough
CT: control target
= control target key end

     0   :  { %10 = vsyncpa [#allocation3], 0  ;;  %s2072_s0 = inlined_call_operand.hbm [shape: f32[2,24,512], index: 0, kind: input, shape index: {}]   ;;  %s2073_s1 = inlined_call_operand.hbm [shape: s32[2,1,512], index: 1, kind: input, shape index: {}]   ;;  %s2074_s2 = inlined_call_operand.hbm [shape: f32[2,72,128], index: 2, kind: output, shape index: {0}]   ;;  %s2075_s3 = inlined_call_operand.hbm [shape: f32[2,24,128], index: 3, kind: output, shape index: {1}]   ;;  %s2076_s4 = inlined_call_operand.hbm [shape: f32[2,2,128], index: 4, kind: output, shape index: {2}]  }
   0x1   :  { %12 = vsyncpa [#allocation3 + $0x1], 0 }
   0x2   :  { %13 = vsyncpa [#allocation6], 0 }
   0x3   :  { %15 = vsyncpa [#allocation6 + $0x1], 0 }
   0x4   :  { %16 = vsyncpa [#allocation4], 0 }
   0x5   :  { %18 = vsyncpa [#allocation4 + $0x1], 0 }
   0x6   :  { %19 = vsyncpa [#allocation9], 0 }
   0x7   :  { %21 = vsyncpa [#allocation9 + $0x1], 0  ;;  %s1521_s15 = smov 0   ;;  %s1523_s16 = smov 0  }
   0x8   :  { %s1525_s17 = smov 0   ;;  %s1527_s18 = smov 0  }
   0x9   :  { %s1529_s19 = smov 0   ;;  %s1531_s20 = smov 0  }
   0xa LB: > { %s1552_s21 = sadd.s32 4294967295, %s1488_s20   ;;  %s2077_s22 = sadd.s32 4294967294, %s1488_s20   ;;  %s1488_s20 = sphi %s1531_s20, %s27_s20   ;;  %s1484_s19 = sphi %s1529_s19, %s2097_s19   ;;  %s1480_s18 = sphi %s1527_s18, %s2096_s18   ;;  %s1476_s17 = sphi %s1525_s17, %s2095_s17   ;;  %s1472_s16 = sphi %s1523_s16, %s2094_s16   ;;  %s1468_s15 = sphi %s1521_s15, %s2093_s15  }
   0xb   : > { %s39_s23 = sadd.s32 1, %s1484_s19  ;;  %s48_s24 = sadd.s32 1, %s1476_s17 }
   0xc   : > { %p41_p0 = scmp.ge.s32.totalorder %s39_s23, 2  ;;  %p55_p1 = scmp.ne.s32.totalorder %s1476_s17, %s1472_s16 }
   0xd   : > { %p56_p2 = scmp.eq.s32.totalorder %s1488_s20, 0  ;;  %p61_p3 = scmp.ne.s32.totalorder %s1472_s16, %s1468_s15 }
   0xe   : > { %s2099_s23 = smov (%p41_p0, %s39_s23), 0  ;;  %p62_p5 = scmp.eq.s32.totalorder %s1552_s21, 0 }
   0xf   : > { %2079 = sst [smem:[#allocation15_spill]] %s2099_s23  ;;  %p1564_p4 = por %p56_p2, %p55_p1 }
  0x10   : > { %s43_s26 = ssub.s32 %s1484_s19, %s2099_s23  ;;  %p113_p6 = scmp.eq.s32.totalorder %s1552_s21, 1 }
  0x11   : > { %p46_p7 = scmp.eq.s32.totalorder %s43_s26, 0  ;;  %p1572_p8 = por %p62_p5, %p61_p3 }
  0x12   : > { %p1576_p9 = por %p113_p6, %p55_p1  ;;  %p119_p10 = scmp.eq.s32.totalorder %s2077_s22, 1 }
  0x13   : > { %s1583_s29 = scalar_select %p46_p7, %s1476_s17, %s48_s24  }
  0x14   : > { %p1585_p11 = por %p119_p10, %p61_p3  ;;  %p1094_p12 = scmp.ge.s32.totalorder %s1488_s20, 2 }
  0x15   : > { %2083 = sst [smem:[#allocation16_spill]] %s1583_s29  ;;  %p1162_p13 = scmp.lt.s32.totalorder %s1488_s20, 2 }
  0x16   : > { %s191_s5 = sand.u32 1, %s1476_s17   ;;  %s1129_s7 = smul.u32 96, %s1484_s19 }
  0x17   : > { %s1128_s6 = smul.u32 96, %s191_s5  ;;  %p1595_p0 = pnand %p1162_p13, %p1564_p4 }
  0x18   : > { %s202_s11 = scalar_lea.hbm %s2072_s0, %s1129_s7  ;;  %p1098_p1 = scmp.ge.s32.totalorder %s1488_s20, 1 }
  0x19   : > { %s195_s12 = scalar_lea.vmem [#allocation2], %s1128_s6  ;;  %s203_s14 = sshll.u32 %s202_s11, 4  ;;  %s204_s14 = int_to_ptr.hbm [resolvable:$true] %s203_s14 }
  0x1a   : > { %s205_s13 = sshll.u32 %s195_s12, 4  ;;  %s192_s24 = scalar_lea.sflag [#allocation3], %s191_s5  ;;  %s206_s13 = int_to_ptr.vmem [resolvable:$true] %s205_s13 }
  0x1b   : > { %s1490_s26 = smov 512   ;;  %s1491_s22 = smov 32  }
  0x1c   : > { %1148 = dma.hbm_to_vmem [thread:$0]  (!%p1595_p0), %s204_s14, 1536, %s206_s13, %s192_s24, %s1490_s26, %s1490_s26, %s1491_s22  }
  0x1d   : > { %p234_p2 = scmp.lt.s32.totalorder %s1488_s20, 3  ;;  %s1096_s25 = sshll.u32 %s191_s5, 2 }
  0x1e   : > { %s1097_s23 = sshll.u32 %s1484_s19, 2  ;;  %s219_s6 = scalar_lea.vmem [#allocation5], %s1096_s25 }
  0x1f   : > { %p235_p3 = pnand %p1098_p1, %p234_p2  ;;  %s225_s7 = scalar_lea.hbm %s2073_s1, %s1097_s23 }
  0x20   : > { %s229_s10 = sshll.u32 %s219_s6, 4  ;;  %s227_s11 = sshll.u32 %s225_s7, 4  ;;  %s230_s10 = int_to_ptr.vmem [resolvable:$true] %s229_s10  ;;  %s228_s11 = int_to_ptr.hbm [resolvable:$true] %s227_s11 }
  0x21   : > { %s216_s12 = scalar_lea.sflag [#allocation6], %s191_s5  ;;  %238 = sbr.rel (%p235_p3) target bundleno = 274 (0x112), region = 28 }
  0x22   : > { %1151 = dma.hbm_to_vmem [thread:$0]  (!%p1595_p0), %s228_s11, 64, %s230_s10, %s216_s12  }
  0x23   : > { %s1613_s22 = sand.u32 (!%p235_p3), 1, %s1472_s16  }
  0x24   : > { %s1130_s13 = smul.u32 (!%p235_p3), 96, %s1613_s22  ;;  %s241_s14 = scalar_lea.sflag (!%p235_p3), [#allocation3], %s1613_s22 }
  0x26   : > { %s1617_s24 = scalar_lea.vmem [#allocation2], %s1130_s13 }
  0x27   : > { %1451 = dma.done.wait (%p1572_p8), %s241_s14, 1536  }
  0x28   : > { %1453 = vsyncadd (%p1572_p8), %s241_s14, 4294965760  ;;  %s1099_s23 = sshll.u32 %s1613_s22, 2  ;;  %s251_s29 = scalar_lea.sflag [#allocation6], %s1613_s22 }
  0x29   : > { %s1625_s5 = scalar_lea.vmem [#allocation5], %s1099_s23 }
  0x2a   : > { %1455 = dma.done.wait (%p1572_p8), %s251_s29, 64  }
  0x2b   : > { %1457 = vsyncadd (%p1572_p8), %s251_s29, 4294967232  ;;  %v327_v0 = vlaneseq  ;;  %v1492_v3 = vmov 4   ;;  %v322_v5 = vld [vmem:[%s1617_s24 + $0x40] sm:$0xff]  ;;  %v1636_v6 = vld [vmem:[%s1617_s24 + $0x48] sm:$0xff]  ;;  %vm588_vm7 = vcmask 195584   ;;  %v1493_v22 = vmov 0.0  }
  0x2c   : > { %v1639_v7 = vld [vmem:[%s1617_s24 + $0x50] sm:$0xff]  ;;  %605 = vmatpush.msra.mxu0 %v322_v5  ;;  %625 = vmatpush.msra.mxu1 %v1636_v6  ;;  %v1643_v9 = vld [vmem:[%s1617_s24 + $0x58] sm:$0xff]  ;;  %v318_v10 = vld [vmem:[%s1617_s24 + $0x20] sm:$0xff]  ;;  %s1100_s27 = sshll.u32 %s1613_s22, 1  ;;  %s1131_s26 = smul.u32 72, %s1613_s22 }
  0x2d   : > { %v574_v1 = vand.u32 127, %v327_v0  ;;  %v1631_v2 = vshrl.u32 %v327_v0, 7  ;;  %v1647_v11 = vld [vmem:[%s1617_s24 + $0x28] sm:$0xff]  ;;  %645 = vmatpush.msra.mxu2 %v1639_v7  ;;  %665 = vmatpush.msra.mxu3 %v1643_v9  ;;  %v1653_v13 = vld [vmem:[%s1617_s24 + $0x30] sm:$0xff]  ;;  %v1656_v14 = vld [vmem:[%s1617_s24 + $0x38] sm:$0xff]  ;;  %s1722_s8 = scalar_lea.vmem [#allocation10], %s1100_s27 }
  0x2e   : > { %v314_v15 = vld [vmem:[%s1617_s24] sm:$0xff]  ;;  %606 = vmatpush.msra.mxu0 %v318_v10  ;;  %626 = vmatpush.msra.mxu1 %v1647_v11  ;;  %v1662_v18 = vld [vmem:[%s1617_s24 + $0x8] sm:$0xff]  ;;  %v1665_v19 = vld [vmem:[%s1617_s24 + $0x10] sm:$0xff]  ;;  %313 = vst [vmem:[%s1722_s8] sm:$0x3] %v1493_v22  ;;  %s1862_s25 = scalar_lea.vmem [#allocation7], %s1131_s26  ;;  %s1133_s9 = smul.u32 72, %s1480_s18 }
  0x2f   : > { %vm576_vm0 = vcmp.le.s32.totalorder %v574_v1, 6  ;;  %vm577_vm1 = vcmp.le.s32.totalorder %v574_v1, 9  ;;  %vm578_vm2 = vcmp.le.s32.totalorder %v574_v1, 17  ;;  %vm575_vm3 = vcmp.le.s32.totalorder %v574_v1, 0  ;;  %646 = vmatpush.msra.mxu2 %v1653_v13  ;;  %666 = vmatpush.msra.mxu3 %v1656_v14  ;;  %v1671_v20 = vld [vmem:[%s1617_s24 + $0x18] sm:$0xff]  ;;  %s885_s11 = sshll.u32 %s1862_s25, 4  ;;  %s1909_s11 = int_to_ptr.vmem [resolvable:$true] %s885_s11 }
  0x30   : > { %v579_v4 = vsel %vm578_vm2, 3, %v1492_v3  ;;  %vm584_vm4 = vcmp.gt.s32.totalorder %v574_v1, 0  ;;  %v331_v17 = vmax.f32 %v314_v15, %v318_v10  ;;  %607 = vmatpush.msra.mxu0 %v314_v15  ;;  %627 = vmatpush.msra.mxu1 %v1662_v18  ;;  %v1679_v47 = vld [vmem:[%s1625_s5] sm:$0xf]  ;;  %v339_v48 = vmax.f32 %v1662_v18, %v1647_v11  ;;  %s884_s10 = scalar_lea.hbm %s2074_s2, %s1133_s9  ;;  %s863_s13 = scalar_lea.sflag [#allocation4], %s1613_s22 }
  0x31   : > { %v580_v8 = vsel %vm577_vm1, 2, %v579_v4  ;;  %647 = vmatpush.msra.mxu2 %v1665_v19  ;;  %667 = vmatpush.msra.mxu3 %v1671_v20  ;;  %v1684_v49 = vadd.s32 8, %v1631_v2  ;;  %v1687_v50 = vadd.s32 16, %v1631_v2  ;;  %v1690_v51 = vperm.slane %v1679_v47, 0  ;;  %s887_s12 = sshll.u32 %s884_s10, 4  ;;  %s1362_s5 = scalar_lea.hbm %s2074_s2, 144  ;;  %s1911_s12 = int_to_ptr.hbm [resolvable:$true] %s887_s12 }
  0x32   : > { %v581_v12 = vsel %vm576_vm0, 1, %v580_v8  ;;  %v332_v21 = vmax.f32 %v331_v17, %v322_v5  ;;  %v340_v52 = vmax.f32 %v339_v48, %v1636_v6  ;;  %s1356_s14 = sshra.s32 %s1911_s12, 4  ;;  %s1357_s14 = int_to_ptr.hbm [resolvable:$true] %s1356_s14 }
  0x33   : > { %v582_v16 = vsel %vm575_vm3, 0, %v581_v12  ;;  %vm451_vm8 = vcmp.eq.s32.totalorder %v1631_v2, %v1690_v51  ;;  %vm455_vm9 = vcmp.eq.s32.totalorder %v1684_v49, %v1690_v51  ;;  %vm459_vm10 = vcmp.eq.s32.totalorder %v1687_v50, %v1690_v51  ;;  %s1358_s24 = scalar_lea.hbm %s1357_s14, 72  ;;  %p1363_p7 = scmp.lt.s32.totalorder %s1357_s14, %s2074_s2 }
  0x34   : > { %vm583_vm5 = vcmp.eq.s32.totalorder %v582_v16, %v1631_v2  ;;  %v333_v24 = vrot.slane %v332_v21, 4  ;;  %v341_v53 = vrot.slane %v340_v52, 4  ;;  %p1359_p4 = scmp.ne.s32.totalorder %s1357_s14, %s1358_s24  ;;  %p1364_p8 = scmp.lt.s32.totalorder %s1362_s5, %s1358_s24 }
  0x35   : > { %vm585_vm6 = vmand %vm583_vm5, %vm584_vm4  ;;  %vm716_vm4 = vcmp.lt.s32.totalorder %v1631_v2, 5 }
  0x36   : > { %v1113_v23 = vsel %vm585_vm6, 1.0, %v1493_v22  ;;  %v334_v25 = vmax.f32 %v332_v21, %v333_v24  ;;  %v342_v58 = vmax.f32 %v340_v52, %v341_v53  ;;  %p1360_p5 = pnand %p1359_p4, %p1576_p9  ;;  %p1365_p10 = por %p1364_p8, %p1363_p7 }
  0x37   : > { %1114 = vmatmul.msk.f32.vlgmr.msra.gmra.mxu0 %vm588_vm7, %v1113_v23  ;;  %1115 = vmatmul.msk.f32.vlgmr.msra.gmra.mxu1 %vm588_vm7, %v1113_v23 }
  0x38   : > { %1116 = vmatmul.msk.f32.vlgmr.msra.gmra.mxu2 %vm588_vm7, %v1113_v23  ;;  %1117 = vmatmul.msk.f32.vlgmr.msra.gmra.mxu3 %vm588_vm7, %v1113_v23  ;;  %v335_v26 = vrot.slane %v334_v25, 2  ;;  %v343_v62 = vrot.slane %v342_v58, 2  ;;  %p1361_p6 = pneg %p1360_p5 }
  0x3a   : > { %v336_v27 = vmax.f32 %v334_v25, %v335_v26  ;;  %v344_v0 = vmax.f32 %v342_v58, %v343_v62  ;;  %p1366_p13 = pnand %p1365_p10, %p1361_p6 }
  0x3c   : > { %v337_v28 = vrot.slane %v336_v27, 1  ;;  %v345_v4 = vrot.slane %v344_v0, 1 }
  0x3e   : > { %v338_v29 = vmax.f32 %v336_v27, %v337_v28 }
  0x40   : > { %v363_v30 = vsub.f32 %v314_v15, %v338_v29  ;;  %v367_v31 = vsub.f32 %v318_v10, %v338_v29  ;;  %v371_v32 = vsub.f32 %v322_v5, %v338_v29  ;;  %v346_v5 = vmax.f32 %v344_v0, %v345_v4 }
  0x42   : > { %v375_v33 = vmul.f32 1.442695, %v363_v30  ;;  %v383_v34 = vmul.f32 1.442695, %v367_v31  ;;  %v391_v35 = vmul.f32 1.442695, %v371_v32  ;;  %v364_v8 = vsub.f32 %v1662_v18, %v346_v5 }
  0x43   : > { %v368_v10 = vsub.f32 %v1647_v11, %v346_v5  ;;  %v372_v12 = vsub.f32 %v1636_v6, %v346_v5  ;;  %v347_v6 = vmax.f32 %v1665_v19, %v1653_v13  ;;  %v1716_v31 = vperm.slane %v1679_v47, 1 }
  0x44   : > { %1218 = vpow2.f32 %v375_v33  ;;  %v377_v15 = vmul.f32 1.442695, %v364_v8  ;;  %v355_v33 = vmax.f32 %v1671_v20, %v1656_v14 }
  0x45   : > { %1220 = vpow2.f32 %v383_v34  ;;  %v385_v16 = vmul.f32 1.442695, %v368_v10  ;;  %v393_v17 = vmul.f32 1.442695, %v372_v12  ;;  %v348_v32 = vmax.f32 %v347_v6, %v1639_v7 }
  0x46   : > { %1222 = vpow2.f32 %v391_v35  ;;  %vm452_vm11 = vcmp.eq.s32.totalorder %v1631_v2, %v1716_v31  ;;  %vm456_vm12 = vcmp.eq.s32.totalorder %v1684_v49, %v1716_v31  ;;  %vm460_vm13 = vcmp.eq.s32.totalorder %v1687_v50, %v1716_v31 }
  0x47   : > { %v349_v34 = vrot.slane %v348_v32, 4 }
  0x4a   : > { %v1219_v36 = vpop.eup %1218 }
  0x4b   : > { %v1221_v37 = vpop.eup %1220 }
  0x4c   : > { %v1223_v38 = vpop.eup %1222  ;;  %v399_v39 = vadd.f32 %v1221_v37, %v1219_v36 }
  0x4e   : > { %v400_v40 = vadd.f32 %v1223_v38, %v399_v39 }
  0x50   : > { %v401_v41 = vrot.slane %v400_v40, 4 }
  0x52   : > { %v402_v42 = vadd.f32 %v401_v41, %v400_v40  ;;  %v350_v40 = vmax.f32 %v348_v32, %v349_v34 }
  0x54   : > { %v403_v43 = vrot.slane %v402_v42, 2  ;;  %v351_v62 = vrot.slane %v350_v40, 2 }
  0x56   : > { %v404_v44 = vadd.f32 %v403_v43, %v402_v42  ;;  %v352_v4 = vmax.f32 %v350_v40, %v351_v62  ;;  %v1102_v40 = vsel %vm452_vm11, 1.0, %v1493_v22  ;;  %v1109_v62 = vsel %vm459_vm10, 1.0, %v1493_v22 }
  0x58   : > { %v405_v45 = vrot.slane %v404_v44, 1  ;;  %v353_v8 = vrot.slane %v352_v4, 1 }
  0x5a   : > { %v406_v46 = vadd.f32 %v405_v45, %v404_v44  ;;  %v354_v10 = vmax.f32 %v352_v4, %v353_v8  ;;  %v1106_v4 = vsel %vm456_vm12, 1.0, %v1493_v22 }
  0x5c   : > { %1224 = vrcp.f32 %v406_v46 }
  0x5d   : > { %1226 = vpow2.f32 %v377_v15 }
  0x5e   : > { %1228 = vpow2.f32 %v385_v16 }
  0x5f   : > { %1230 = vpow2.f32 %v393_v17 }
  0x62   : > { %v1225_v54 = vpop.eup %1224 }
  0x63   : > { %v435_v55 = vmul.f32 %v1225_v54, %v1219_v36  ;;  %v439_v56 = vmul.f32 %v1225_v54, %v1221_v37  ;;  %v443_v57 = vmul.f32 %v1225_v54, %v1223_v38  ;;  %v1227_v21 = vpop.eup %1226  ;;  %v356_v36 = vmax.f32 %v355_v33, %v1643_v9 }
  0x64   : > { %v1229_v23 = vpop.eup %1228 }
  0x65   : > { %v463_v59 = vsel %vm451_vm8, %v435_v55, 0.0  ;;  %v467_v60 = vsel %vm455_vm9, %v439_v56, 0.0  ;;  %v471_v61 = vsel %vm459_vm10, %v443_v57, 0.0  ;;  %v1231_v24 = vpop.eup %1230  ;;  %v407_v25 = vadd.f32 %v1229_v23, %v1227_v21 }
  0x66   : > { %v475_v63 = vadd.f32 %v467_v60, %v463_v59  ;;  %v357_v41 = vrot.slane %v356_v36, 4 }
  0x67   : > { %v408_v26 = vadd.f32 %v1231_v24, %v407_v25 }
  0x68   : > { %v1708_v1 = vadd.f32 %v475_v63, %v471_v61  ;;  %v358_v63 = vmax.f32 %v356_v36, %v357_v41 }
  0x69   : > { %v409_v27 = vrot.slane %v408_v26, 4 }
  0x6a   : > { %v359_v5 = vrot.slane %v358_v63, 2 }
  0x6b   : > { %v410_v28 = vadd.f32 %v409_v27, %v408_v26 }
  0x6d   : > { %v411_v29 = vrot.slane %v410_v28, 2 }
  0x6f   : > { %v412_v18 = vadd.f32 %v411_v29, %v410_v28 }
  0x71   : > { %v413_v30 = vrot.slane %v412_v18, 1 }
  0x73   : > { %v414_v11 = vadd.f32 %v413_v30, %v412_v18 }
  0x75   : > { %1232 = vrcp.f32 %v414_v11 }
  0x7b   : > { %v1233_v35 = vpop.eup %1232 }
  0x7c   : > { %v436_v37 = vmul.f32 %v1233_v35, %v1227_v21  ;;  %v440_v38 = vmul.f32 %v1233_v35, %v1229_v23  ;;  %v444_v39 = vmul.f32 %v1233_v35, %v1231_v24 }
  0x7e   : > { %v464_v42 = vsel %vm452_vm11, %v436_v37, 0.0  ;;  %v468_v43 = vsel %vm456_vm12, %v440_v38, 0.0  ;;  %v472_v44 = vsel %vm460_vm13, %v444_v39, 0.0  ;;  %v1742_v45 = vadd.f32 %v436_v37, %v435_v55 }
  0x7f   : > { %v483_v46 = vadd.f32 %v468_v43, %v464_v42  ;;  %v1744_v48 = vadd.f32 %v464_v42, %v463_v59  ;;  %v1746_v52 = vadd.f32 %v468_v43, %v467_v60  ;;  %v1748_v53 = vadd.f32 %v472_v44, %v471_v61 }
  0x80   : > { %v1750_v54 = vadd.f32 %v440_v38, %v439_v56  ;;  %v1752_v58 = vadd.f32 %v444_v39, %v443_v57  ;;  %v360_v55 = vmax.f32 %v358_v63, %v359_v5  ;;  %v365_v59 = vsub.f32 %v1665_v19, %v354_v10 }
  0x81   : > { %v1754_v0 = vadd.f32 %v483_v46, %v472_v44  ;;  %v369_v60 = vsub.f32 %v1653_v13, %v354_v10  ;;  %v373_v61 = vsub.f32 %v1639_v7, %v354_v10  ;;  %v1101_v39 = vsel %vm451_vm8, 1.0, %v1493_v22 }
  0x82   : > { %v361_v12 = vrot.slane %v360_v55, 1  ;;  %v379_v15 = vmul.f32 1.442695, %v365_v59  ;;  %v1105_v46 = vsel %vm455_vm9, 1.0, %v1493_v22  ;;  %v449_v63 = vperm.slane %v1679_v47, 2 }
  0x83   : > { %v387_v57 = vmul.f32 1.442695, %v369_v60  ;;  %v395_v16 = vmul.f32 1.442695, %v373_v61  ;;  %v1110_v5 = vsel %vm460_vm13, 1.0, %v1493_v22  ;;  %v561_v10 = vadd.f32 %v1102_v40, %v1101_v39 }
  0x84   : > { %v362_v56 = vmax.f32 %v360_v55, %v361_v12  ;;  %1234 = vpow2.f32 %v379_v15  ;;  %v562_v60 = vadd.f32 %v1106_v4, %v1105_v46  ;;  %v563_v61 = vadd.f32 %v1110_v5, %v1109_v62 }
  0x85   : > { %1236 = vpow2.f32 %v387_v57  ;;  %vm453_vm14 = vcmp.eq.s32.totalorder %v1631_v2, %v449_v63  ;;  %vm457_vm15 = vcmp.eq.s32.totalorder %v1684_v49, %v449_v63  ;;  %vm461_vm0 = vcmp.eq.s32.totalorder %v1687_v50, %v449_v63 }
  0x86   : > { %v366_v17 = vsub.f32 %v1671_v20, %v362_v56  ;;  %v370_v21 = vsub.f32 %v1656_v14, %v362_v56  ;;  %v374_v23 = vsub.f32 %v1643_v9, %v362_v56  ;;  %1238 = vpow2.f32 %v395_v16 }
  0x87   : > { %v450_v56 = vperm.slane %v1679_v47, 3  ;;  %v1103_v31 = vsel %vm453_vm14, 1.0, %v1493_v22  ;;  %v1107_v57 = vsel %vm457_vm15, 1.0, %v1493_v22  ;;  %v1111_v16 = vsel %vm461_vm0, 1.0, %v1493_v22 }
  0x88   : > { %v381_v24 = vmul.f32 1.442695, %v366_v17  ;;  %v389_v25 = vmul.f32 1.442695, %v370_v21  ;;  %v397_v19 = vmul.f32 1.442695, %v374_v23 }
  0x89   : > { %vm454_vm1 = vcmp.eq.s32.totalorder %v1631_v2, %v450_v56  ;;  %vm458_vm2 = vcmp.eq.s32.totalorder %v1684_v49, %v450_v56  ;;  %vm462_vm3 = vcmp.eq.s32.totalorder %v1687_v50, %v450_v56  ;;  %v477_v23 = vrot.slane %v1708_v1, 4 }
  0x8a   : > { %1240 = vpow2.f32 %v381_v24  ;;  %v1762_v13 = vpop.eup %1234  ;;  %v1104_v24 = vsel %vm454_vm1, 1.0, %v1493_v22 }
  0x8b   : > { %1242 = vpow2.f32 %v389_v25  ;;  %v1764_v7 = vpop.eup %1236  ;;  %v1108_v25 = vsel %vm458_vm2, 1.0, %v1493_v22  ;;  %v478_v39 = vadd.f32 %v477_v23, %v1708_v1 }
  0x8c   : > { %1244 = vpow2.f32 %v397_v19  ;;  %v1766_v26 = vpop.eup %1238  ;;  %v415_v14 = vadd.f32 %v1764_v7, %v1762_v13  ;;  %v1112_v19 = vsel %vm462_vm3, 1.0, %v1493_v22 }
  0x8e   : > { %v416_v9 = vadd.f32 %v1766_v26, %v415_v14 }
  0x90   : > { %v1770_v20 = vpop.eup %1240  ;;  %v417_v29 = vrot.slane %v416_v9, 4 }
  0x91   : > { %v1773_v27 = vpop.eup %1242 }
  0x92   : > { %v1775_v28 = vpop.eup %1244  ;;  %v423_v18 = vadd.f32 %v1773_v27, %v1770_v20  ;;  %v418_v30 = vadd.f32 %v417_v29, %v416_v9  ;;  %v564_v9 = vadd.f32 %v1104_v24, %v1103_v31  ;;  %v565_v29 = vadd.f32 %v1108_v25, %v1107_v57 }
  0x93   : > { %v479_v57 = vrot.slane %v478_v39, 2 }
  0x94   : > { %v424_v11 = vadd.f32 %v1775_v28, %v423_v18  ;;  %v419_v6 = vrot.slane %v418_v30, 2  ;;  %v566_v18 = vadd.f32 %v1112_v19, %v1111_v16 }
  0x96   : > { %v425_v32 = vrot.slane %v424_v11, 4  ;;  %v420_v35 = vadd.f32 %v419_v6, %v418_v30 }
  0x98   : > { %v426_v36 = vadd.f32 %v425_v32, %v424_v11  ;;  %v421_v41 = vrot.slane %v420_v35, 1 }
  0x9a   : > { %v427_v42 = vrot.slane %v426_v36, 2  ;;  %v422_v8 = vadd.f32 %v421_v41, %v420_v35 }
  0x9c   : > { %v428_v55 = vadd.f32 %v427_v42, %v426_v36  ;;  %1246 = vrcp.f32 %v422_v8  ;;  %v567_v36 = vadd.f32 %v564_v9, %v561_v10 }
  0x9e   : > { %v429_v12 = vrot.slane %v428_v55, 1  ;;  %845 = vst [vmem:[%s1862_s25 + $0x30] sm:$0xff] %v567_v36 }
  0xa0   : > { %v430_v15 = vadd.f32 %v429_v12, %v428_v55 }
  0xa2   : > { %1248 = vrcp.f32 %v430_v15  ;;  %v1247_v14 = vpop.eup %1246 }
  0xa3   : > { %v437_v11 = vmul.f32 %v1247_v14, %v1762_v13  ;;  %v441_v6 = vmul.f32 %v1247_v14, %v1764_v7  ;;  %v445_v35 = vmul.f32 %v1247_v14, %v1766_v26 }
  0xa5   : > { %v1852_v26 = vsel %vm453_vm14, %v437_v11, 0.0  ;;  %v1856_v1 = vsel %vm457_vm15, %v441_v6, 0.0  ;;  %v1860_v62 = vsel %vm461_vm0, %v445_v35, 0.0 }
  0xa8   : > { %v1249_v42 = vpop.eup %1248 }
  0xa9   : > { %v438_v13 = vmul.f32 %v1249_v42, %v1770_v20  ;;  %v442_v7 = vmul.f32 %v1249_v42, %v1773_v27  ;;  %v446_v46 = vmul.f32 %v1249_v42, %v1775_v28 }
  0xab   : > { %v1869_v27 = vsel %vm454_vm1, %v438_v13, 0.0  ;;  %v1873_v28 = vsel %vm458_vm2, %v442_v7, 0.0  ;;  %v531_v63 = vadd.f32 %v438_v13, %v437_v11  ;;  %v1881_v8 = vsel %vm462_vm3, %v446_v46, 0.0 }
  0xac   : > { %v522_v55 = vadd.f32 %v1869_v27, %v1852_v26  ;;  %v523_v10 = vadd.f32 %v1873_v28, %v1856_v1  ;;  %v532_v12 = vadd.f32 %v442_v7, %v441_v6 }
  0xad   : > { %v534_v50 = vadd.f32 %v531_v63, %v1742_v45 }
  0xae   : > { %v535_v31 = vadd.f32 %v532_v12, %v1750_v54 }
  0xaf   : > { %842 = vst [vmem:[%s1862_s25 + $0x18] sm:$0xff] %v534_v50 }
  0xb0   : > { %843 = vst [vmem:[%s1862_s25 + $0x20] sm:$0xff] %v535_v31 }
  0xb4   : > { %v1780_v33 = vpop.f32.mrf.mxu0  ;;  %v1782_v34 = vpop.f32.mrf.mxu1 }
  0xb5   : > { %v680_v37 = vrot.slane %v1780_v33, 4  ;;  %v686_v38 = vrot.slane %v1782_v34, 4 }
  0xb7   : > { %v681_v43 = vmax.f32 %v1780_v33, %v680_v37  ;;  %v687_v44 = vmax.f32 %v1782_v34, %v686_v38  ;;  %v568_v37 = vadd.f32 %v565_v29, %v562_v60  ;;  %v569_v38 = vadd.f32 %v566_v18, %v563_v61 }
  0xb8   : > { %v526_v60 = vadd.f32 %v523_v10, %v1746_v52 }
  0xb9   : > { %v682_v59 = vrot.slane %v681_v43, 2  ;;  %v688_v51 = vrot.slane %v687_v44, 2  ;;  %846 = vst [vmem:[%s1862_s25 + $0x38] sm:$0xff] %v568_v37 }
  0xba   : > { %847 = vst [vmem:[%s1862_s25 + $0x40] sm:$0xff] %v569_v38 }
  0xbb   : > { %v683_v17 = vmax.f32 %v681_v43, %v682_v59  ;;  %v689_v21 = vmax.f32 %v687_v44, %v688_v51  ;;  %v1844_v41 = vpop.f32.mrf.mxu2  ;;  %v485_v44 = vrot.slane %v1754_v0, 4  ;;  %v1877_v5 = vpop.f32.mrf.mxu3  ;;  %v533_v59 = vadd.f32 %v446_v46, %v445_v35  ;;  %840 = vst [vmem:[%s1862_s25 + $0x8] sm:$0xff] %v526_v60 }
  0xbc   : > { %v692_v20 = vrot.slane %v1844_v41, 4  ;;  %v525_v51 = vadd.f32 %v522_v55, %v1744_v48  ;;  %v698_v56 = vrot.slane %v1877_v5, 4 }
  0xbd   : > { %v684_v30 = vrot.slane %v683_v17, 1  ;;  %v690_v32 = vrot.slane %v689_v21, 1  ;;  %v536_v45 = vadd.f32 %v533_v59, %v1752_v58  ;;  %v486_v52 = vadd.f32 %v485_v44, %v1754_v0 }
  0xbe   : > { %v693_v61 = vmax.f32 %v1844_v41, %v692_v20  ;;  %839 = vst [vmem:[%s1862_s25] sm:$0xff] %v525_v51 }
  0xbf   : > { %v685_v40 = vmax.f32 %v683_v17, %v684_v30  ;;  %v691_v43 = vmax.f32 %v689_v21, %v690_v32  ;;  %v487_v0 = vrot.slane %v486_v52, 2  ;;  %844 = vst [vmem:[%s1862_s25 + $0x28] sm:$0xff] %v536_v45  ;;  %v480_v17 = vadd.f32 %v479_v57, %v478_v39 }
  0xc0   : > { %v694_v16 = vrot.slane %v693_v61, 2 }
  0xc1   : > { %v704_v4 = vsub.f32 %v1780_v33, %v685_v40  ;;  %v705_v49 = vsub.f32 %v1782_v34, %v691_v43  ;;  %v524_v33 = vadd.f32 %v1881_v8, %v1860_v62 }
  0xc2   : > { %v695_v54 = vmax.f32 %v693_v61, %v694_v16 }
  0xc3   : > { %v527_v34 = vadd.f32 %v524_v33, %v1748_v53  ;;  %v708_v48 = vmul.f32 1.442695, %v704_v4  ;;  %v710_v15 = vmul.f32 1.442695, %v705_v49  ;;  %v699_v53 = vmax.f32 %v1877_v5, %v698_v56 }
  0xc4   : > { %v696_v21 = vrot.slane %v695_v54, 1 }
  0xc5   : > { %1250 = vpow2.f32 %v708_v48  ;;  %841 = vst [vmem:[%s1862_s25 + $0x10] sm:$0xff] %v527_v34  ;;  %v700_v58 = vrot.slane %v699_v53, 2 }
  0xc6   : > { %1252 = vpow2.f32 %v710_v15 }
  0xc7   : > { %v701_v23 = vmax.f32 %v699_v53, %v700_v58 }
  0xc8   : > { %1369 = shalt.err (!%p1366_p13)
}
  0xc9   : > { %s1494_s25 = smov 128   ;;  %s1495_s9 = smov 8   ;;  %v697_v25 = vmax.f32 %v695_v54, %v696_v21  ;;  %v702_v19 = vrot.slane %v701_v23, 1  ;;  %v488_v9 = vadd.f32 %v487_v0, %v486_v52  ;;  %vm675_vm5 = vcmp.le.s32.totalorder %v1679_v47, 17 }
  0xca   : > { %1139 = dma.vmem_to_hbm [thread:$0]  (%p1576_p9), %s1909_s11, 1152, %s1911_s12, %s863_s13, %s1494_s25, %s1494_s25, %s1495_s9   ;;  %v481_v18 = vrot.slane %v480_v17, 1  ;;  %vm674_vm6 = vcmp.le.s32.totalorder %v1679_v47, 9  ;;  %v491_v36 = vadd.f32 %v1856_v1, %v1852_v26  ;;  %v676_v37 = vsel %vm675_vm5, 3, %v1492_v3 }
  0xcb   : > { %v1251_v24 = vpop.eup %1250  ;;  %v706_v6 = vsub.f32 %v1844_v41, %v697_v25  ;;  %v703_v35 = vmax.f32 %v701_v23, %v702_v19  ;;  %v489_v40 = vrot.slane %v488_v9, 1  ;;  %v499_v41 = vadd.f32 %v1873_v28, %v1869_v27  ;;  %s1132_s7 = smul.u32 24, %s1613_s22  ;;  %s867_s13 = sand.u32 1, %s1552_s21  }
  0xcc   : > { %v1253_v14 = vpop.eup %1252  ;;  %v1936_v29 = vsel %vm716_vm4, %v1251_v24, 0.0  ;;  %v482_v44 = vadd.f32 %v481_v18, %v480_v17  ;;  %vm673_vm7 = vcmp.le.s32.totalorder %v1679_v47, 6  ;;  %v677_v7 = vsel %vm674_vm6, 2, %v676_v37  ;;  %s1134_s6 = smul.u32 24, %s1480_s18  ;;  %s2012_s21 = scalar_lea.sflag [#allocation9], %s867_s13 }
  0xcd   : > { %v721_v30 = vrot.slane %v1936_v29, 4  ;;  %v1941_v11 = vsel %vm716_vm4, %v1253_v14, 0.0  ;;  %v712_v39 = vmul.f32 1.442695, %v706_v6  ;;  %v707_v43 = vsub.f32 %v1877_v5, %v703_v35  ;;  %s1999_s10 = scalar_lea.vmem [#allocation8], %s1132_s7  ;;  %s1390_s26 = scalar_lea.hbm %s2075_s3, 48 }
  0xce   : > { %v727_v32 = vrot.slane %v1941_v11, 4  ;;  %v492_v3 = vadd.f32 %v491_v36, %v1860_v62  ;;  %v490_v20 = vadd.f32 %v489_v40, %v488_v9  ;;  %v500_v4 = vadd.f32 %v499_v41, %v1881_v8  ;;  %s901_s12 = scalar_lea.hbm %s2075_s3, %s1134_s6  ;;  %s902_s14 = sshll.u32 %s1999_s10, 4  ;;  %s903_s14 = int_to_ptr.vmem [resolvable:$true] %s902_s14 }
  0xcf   : > { %v722_v38 = vadd.f32 %v721_v30, %v1936_v29  ;;  %1254 = vpow2.f32 %v712_v39  ;;  %v714_v26 = vmul.f32 1.442695, %v707_v43  ;;  %vm672_vm8 = vcmp.le.s32.totalorder %v1679_v47, 0  ;;  %s904_s24 = sshll.u32 %s901_s12, 4  ;;  %s905_s24 = int_to_ptr.hbm [resolvable:$true] %s904_s24 }
  0xd0   : > { %v728_v42 = vadd.f32 %v727_v32, %v1941_v11  ;;  %v678_v5 = vsel %vm673_vm7, 1, %v677_v7  ;;  %v493_v10 = vrot.slane %v492_v3, 4  ;;  %v501_v59 = vrot.slane %v500_v4, 4  ;;  %s1384_s23 = sshra.s32 %s905_s24, 4  ;;  %s1385_s23 = int_to_ptr.hbm [resolvable:$true] %s1384_s23 }
  0xd1   : > { %v723_v13 = vrot.slane %v722_v38, 2  ;;  %1256 = vpow2.f32 %v714_v26  ;;  %v679_v33 = vsel %vm672_vm8, 0, %v678_v5  ;;  %s1386_s29 = scalar_lea.hbm %s1385_s23, 24  ;;  %p1391_p3 = scmp.lt.s32.totalorder %s1385_s23, %s2075_s3 }
  0xd2   : > { %v729_v46 = vrot.slane %v728_v42, 2  ;;  %1258 = vlog2.f32 %v482_v44  ;;  %v494_v47 = vadd.f32 %v493_v10, %v492_v3  ;;  %v753_v51 = vperm.slane %v679_v33, 0  ;;  %p1387_p0 = scmp.ne.s32.totalorder %s1385_s23, %s1386_s29  ;;  %p1392_p4 = scmp.lt.s32.totalorder %s1390_s26, %s1386_s29 }
  0xd3   : > { %v724_v1 = vadd.f32 %v723_v13, %v722_v38  ;;  %1260 = vlog2.f32 %v490_v20  ;;  %v754_v34 = vperm.slane %v679_v33, 1  ;;  %v502_v45 = vadd.f32 %v501_v59, %v500_v4 }
  0xd4   : > { %v730_v63 = vadd.f32 %v729_v46, %v728_v42  ;;  %v495_v53 = vrot.slane %v494_v47, 2  ;;  %vm757_vm9 = vcmp.eq.s32.totalorder %v1631_v2, %v753_v51  ;;  %v755_v17 = vperm.slane %v679_v33, 2  ;;  %p1388_p1 = pnand %p1387_p0, %p1576_p9  ;;  %p1393_p5 = por %p1392_p4, %p1391_p3 }
  0xd5   : > { %v725_v55 = vrot.slane %v724_v1, 1  ;;  %v1255_v28 = vpop.eup %1254  ;;  %vm758_vm10 = vcmp.eq.s32.totalorder %v1631_v2, %v754_v34  ;;  %v503_v24 = vrot.slane %v502_v45, 2  ;;  %v1118_v9 = vsel %vm757_vm9, 1.0, %v1493_v22 }
  0xd6   : > { %v731_v27 = vrot.slane %v730_v63, 1  ;;  %v1960_v62 = vsel %vm716_vm4, %v1255_v28, 0.0  ;;  %v756_v30 = vperm.slane %v679_v33, 3  ;;  %v1119_v35 = vsel %vm758_vm10, 1.0, %v1493_v22  ;;  %p1389_p2 = pneg %p1388_p1 }
  0xd7   : > { %v726_v49 = vadd.f32 %v725_v55, %v724_v1  ;;  %v733_v8 = vrot.slane %v1960_v62, 4  ;;  %v1257_v50 = vpop.eup %1256  ;;  %vm1977_vm11 = vcmp.eq.s32.totalorder %v1631_v2, %v755_v17  ;;  %v815_v44 = vadd.f32 %v1119_v35, %v1118_v9 }
  0xd8   : > { %v732_v12 = vadd.f32 %v731_v27, %v730_v63  ;;  %v1966_v61 = vsel %vm716_vm4, %v1257_v50, 0.0  ;;  %v1259_v56 = vpop.eup %1258  ;;  %v1120_v42 = vsel %vm1977_vm11, 1.0, %v1493_v22  ;;  %vm1985_vm12 = vcmp.eq.s32.totalorder %v1631_v2, %v756_v30  ;;  %p1394_p6 = pnand %p1393_p5, %p1389_p2 }
  0xd9   : > { %1262 = vrcp.f32 %v726_v49  ;;  %v734_v60 = vadd.f32 %v733_v8, %v1960_v62  ;;  %v739_v31 = vrot.slane %v1966_v61, 4  ;;  %v1261_v52 = vpop.eup %1260  ;;  %v508_v16 = vmul.f32 0.6931472, %v1259_v56 }
  0xda   : > { %1264 = vrcp.f32 %v732_v12  ;;  %v510_v23 = vmul.f32 0.6931472, %v1261_v52  ;;  %v1121_v46 = vsel %vm1985_vm12, 1.0, %v1493_v22 }
  0xdb   : > { %v735_v48 = vrot.slane %v734_v60, 2  ;;  %v740_v15 = vadd.f32 %v739_v31, %v1966_v61  ;;  %v515_v26 = vsub.f32 0.0, %v508_v16  ;;  %v816_v20 = vadd.f32 %v1121_v46, %v1120_v42 }
  0xdc   : > { %v516_v3 = vsub.f32 0.0, %v510_v23 }
  0xdd   : > { %v736_v54 = vadd.f32 %v735_v48, %v734_v60  ;;  %v741_v21 = vrot.slane %v740_v15, 2  ;;  %v817_v5 = vadd.f32 %v816_v20, %v815_v44 }
  0xde   : > { %v1993_v63 = vadd.f32 %v516_v3, %v515_v26 }
  0xdf   : > { %v1263_v57 = vpop.eup %1262  ;;  %v737_v19 = vrot.slane %v736_v54, 1  ;;  %v742_v18 = vadd.f32 %v741_v21, %v740_v15  ;;  %856 = vst [vmem:[%s1999_s10 + $0x10] sm:$0xff] %v817_v5 }
  0xe0   : > { %v1265_v58 = vpop.eup %1264  ;;  %v749_v0 = vmul.f32 %v1263_v57, %v1936_v29  ;;  %v496_v29 = vadd.f32 %v495_v53, %v494_v47 }
  0xe1   : > { %v750_v25 = vmul.f32 %v1265_v58, %v1941_v11  ;;  %v738_v36 = vadd.f32 %v737_v19, %v736_v54  ;;  %v743_v39 = vrot.slane %v742_v18, 1  ;;  %v504_v11 = vadd.f32 %v503_v24, %v502_v45 }
  0xe2   : > { %v761_v14 = vsel %vm757_vm9, %v749_v0, 0.0  ;;  %v497_v4 = vrot.slane %v496_v29, 1 }
  0xe3   : > { %v765_v6 = vrot.slane %v761_v14, 4  ;;  %v762_v32 = vsel %vm758_vm10, %v750_v25, 0.0  ;;  %1266 = vrcp.f32 %v738_v36  ;;  %v744_v41 = vadd.f32 %v743_v39, %v742_v18 }
  0xe4   : > { %v771_v37 = vrot.slane %v762_v32, 4  ;;  %v505_v55 = vrot.slane %v504_v11, 1  ;;  %v498_v33 = vadd.f32 %v497_v4, %v496_v29  ;;  %v801_v34 = vadd.f32 %v762_v32, %v761_v14 }
  0xe5   : > { %v766_v40 = vadd.f32 %v765_v6, %v761_v14  ;;  %1268 = vrcp.f32 %v744_v41 }
  0xe6   : > { %v772_v43 = vadd.f32 %v771_v37, %v762_v32  ;;  %v506_v12 = vadd.f32 %v505_v55, %v504_v11  ;;  %1270 = vlog2.f32 %v498_v33 }
  0xe7   : > { %v767_v7 = vrot.slane %v766_v40, 2 }
  0xe8   : > { %v773_v1 = vrot.slane %v772_v43, 2  ;;  %1272 = vlog2.f32 %v506_v12 }
  0xe9   : > { %v1267_v2 = vpop.eup %1266  ;;  %v768_v27 = vadd.f32 %v767_v7, %v766_v40 }
  0xea   : > { %v774_v28 = vadd.f32 %v773_v1, %v772_v43  ;;  %v751_v10 = vmul.f32 %v1267_v2, %v1960_v62  ;;  %v804_v62 = vadd.f32 %v750_v25, %v749_v0 }
  0xeb   : > { %v1269_v49 = vpop.eup %1268  ;;  %v769_v59 = vrot.slane %v768_v27, 1 }
  0xec   : > { %v763_v22 = vsel %vm1977_vm11, %v751_v10, 0.0  ;;  %v752_v50 = vmul.f32 %v1269_v49, %v1966_v61  ;;  %v775_v47 = vrot.slane %v774_v28, 1  ;;  %v1271_v0 = vpop.eup %1270 }
  0xed   : > { %v777_v8 = vrot.slane %v763_v22, 4  ;;  %v770_v61 = vadd.f32 %v769_v59, %v768_v27 }
  0xee   : > { %v764_v60 = vsel %vm1985_vm12, %v752_v50, 0.0  ;;  %v805_v56 = vadd.f32 %v752_v50, %v751_v10  ;;  %v776_v15 = vadd.f32 %v775_v47, %v774_v28  ;;  %v1273_v21 = vpop.eup %1272 }
  0xef   : > { %v778_v51 = vadd.f32 %v777_v8, %v763_v22  ;;  %v783_v31 = vrot.slane %v764_v60, 4  ;;  %v802_v45 = vadd.f32 %v764_v60, %v763_v22  ;;  %1274 = vlog2.f32 %v770_v61 }
  0xf0   : > { %v806_v52 = vadd.f32 %v805_v56, %v804_v62  ;;  %1276 = vlog2.f32 %v776_v15 }
  0xf1   : > { %v779_v48 = vrot.slane %v778_v51, 2  ;;  %v784_v57 = vadd.f32 %v783_v31, %v764_v60  ;;  %v803_v16 = vadd.f32 %v802_v45, %v801_v34 }
  0xf2   : > { %855 = vst [vmem:[%s1999_s10 + $0x8] sm:$0xff] %v806_v52 }
  0xf3   : > { %v780_v53 = vadd.f32 %v779_v48, %v778_v51  ;;  %v785_v54 = vrot.slane %v784_v57, 2  ;;  %854 = vst [vmem:[%s1999_s10] sm:$0xff] %v803_v16 }
  0xf5   : > { %v781_v58 = vrot.slane %v780_v53, 1  ;;  %v786_v17 = vadd.f32 %v785_v54, %v784_v57 }
  0xf7   : > { %v782_v23 = vadd.f32 %v781_v58, %v780_v53 }
  0xf8   : > { %1397 = shalt.err (!%p1394_p6)
}
  0xf9   : > { %1140 = dma.vmem_to_hbm [thread:$0]  (%p1576_p9), %s903_s14, 384, %s905_s24, %s2012_s21, %s1494_s25, %s1494_s25, %s1495_s9   ;;  %v787_v24 = vrot.slane %v786_v17, 1  ;;  %1278 = vlog2.f32 %v782_v23  ;;  %v512_v25 = vmul.f32 0.6931472, %v1271_v0  ;;  %v514_v19 = vmul.f32 0.6931472, %v1273_v21  ;;  %v1275_v9 = vpop.eup %1274 }
  0xfa   : > { %v1277_v18 = vpop.eup %1276  ;;  %v790_v35 = vmul.f32 0.6931472, %v1275_v9  ;;  %s1125_s25 = sshll.u32 %s1480_s18, 1  ;;  %vm858_vm13 = vcmask 1040384   ;;  %v857_v46 = vld [vmem:[%s1722_s8] sm:$0x3] }
  0xfb   : > { %v788_v14 = vadd.f32 %v787_v24, %v786_v17  ;;  %v517_v30 = vsub.f32 0.0, %v512_v25  ;;  %v518_v6 = vsub.f32 0.0, %v514_v19  ;;  %v792_v36 = vmul.f32 0.6931472, %v1277_v18  ;;  %s917_s22 = scalar_lea.hbm %s2076_s4, %s1125_s25  ;;  %s919_s11 = sshll.u32 %s1722_s8, 4  ;;  %s920_s11 = int_to_ptr.vmem [resolvable:$true] %s919_s11 }
  0xfc   : > { %v797_v39 = vsub.f32 0.0, %v790_v35  ;;  %s921_s12 = sshll.u32 %s917_s22, 4  ;;  %s1418_s23 = scalar_lea.hbm %s2076_s4, 4  ;;  %s922_s12 = int_to_ptr.hbm [resolvable:$true] %s921_s12 }
  0xfd   : > { %1280 = vlog2.f32 %v788_v14  ;;  %v571_v38 = vadd.f32 %v518_v6, %v517_v30  ;;  %v798_v11 = vsub.f32 0.0, %v792_v36  ;;  %s1412_s18 = sshra.s32 %s922_s12, 4  ;;  %s1413_s18 = int_to_ptr.hbm [resolvable:$true] %s1412_s18 }
  0xfe   : > { %s1414_s13 = scalar_lea.hbm %s1413_s18, 2  ;;  %p1419_p13 = scmp.lt.s32.totalorder %s1413_s18, %s2076_s4 }
  0xff   : > { %v1279_v32 = vpop.eup %1278  ;;  %v572_v44 = vadd.f32 %v571_v38, %v1993_v63  ;;  %v818_v41 = vadd.f32 %v798_v11, %v797_v39  ;;  %p1415_p7 = scmp.ne.s32.totalorder %s1413_s18, %s1414_s13  ;;  %p1420_p0 = scmp.lt.s32.totalorder %s1418_s23, %s1414_s13 }
 0x100   : > { %v794_v29 = vmul.f32 0.6931472, %v1279_v32 }
 0x101   : > { %p1416_p8 = pnand %p1415_p7, %p1576_p9  ;;  %p1421_p1 = por %p1420_p0, %p1419_p13 }
 0x102   : > { %v799_v40 = vsub.f32 0.0, %v794_v29 }
 0x103   : > { %v1281_v37 = vpop.eup %1280  ;;  %p1417_p10 = pneg %p1416_p8 }
 0x104   : > { %v796_v42 = vmul.f32 0.6931472, %v1281_v37 }
 0x105   : > { %p1422_p2 = pnand %p1421_p1, %p1417_p10 }
 0x106   : > { %v800_v43 = vsub.f32 0.0, %v796_v42 }
 0x108   : > { %v819_v13 = vadd.f32 %v800_v43, %v799_v40 }
 0x10a   : > { %v820_v7 = vadd.f32 %v819_v13, %v818_v41 }
 0x10c   : > { %v859_v26 = vsel %vm858_vm13, %v572_v44, %v820_v7 }
 0x10d   : > { %v860_v3 = vadd.f32 %v859_v26, %v857_v46 }
 0x10f   : > { %861 = vst [vmem:[%s1722_s8] sm:$0x3] %v860_v3 }
 0x110   : > { %1425 = shalt.err (!%p1422_p2)
}
 0x111   : > { %1141 = dma.vmem_to_hbm [thread:$0]  (%p1576_p9), %s920_s11, 32, %s922_s12, %s2012_s21  }
 0x112 PF: > { %s933_s8 = sand.u32 1, %s1468_s15   ;;  %p1153_p3 = pnand %p1094_p12, %p1585_p11 }
 0x113   : > { %s934_s27 = scalar_lea.sflag [#allocation4], %s933_s8 }
 0x114   : > { %p1154_p4 = pneg %p1153_p3 }
 0x116   : > { %1459 = dma.done.wait (%p1154_p4), %s934_s27, 1152  }
 0x117   : > { %1461 = vsyncadd (%p1154_p4), %s934_s27, 4294966144  ;;  %s2090_s26 = sadd.s32 4294967294, %s1488_s20  }
 0x118   : > { %s943_s7 = sand.u32 1, %s2090_s26  }
 0x119   : > { %s944_s6 = scalar_lea.sflag [#allocation9], %s943_s7 }
 0x11a   : > { %1463 = dma.done.wait (%p1154_p4), %s944_s6, 416  }
 0x11b   : > { %1465 = vsyncadd (%p1154_p4), %s944_s6, 4294966880  ;;  %s27_s20 = sadd.s32 1, %s1488_s20   ;;  %s2091_s28 = sld [smem:[#allocation16_spill]] }
 0x11c   : > { %p24_p9 = scmp.ge.s32.totalorder %s27_s20, 4   ;;  %s2092_s30 = sld [smem:[#allocation15_spill]] }
 0x11d   : > { %s2093_s15 = smov %s1472_s16  ;;  %s2094_s16 = smov %s1476_s17 }
 0x11e   : > { %s2096_s18 = smov %s1484_s19  ;;  %26 = sbr.rel (!%p24_p9) target bundleno = 10 (0xa), region = 122 }
 0x121   : > { %s2095_s17 = smov %s2091_s28 }
 0x122   : > { %s2097_s19 = smov %s2092_s30 }
 0x123   :  { %960 = vsyncpa [#allocation3], 1 }
 0x124   :  { %962 = vsyncpa [#allocation3 + $0x1], 1 }
 0x125   :  { %963 = vsyncpa [#allocation6], 1 }
 0x126   :  { %965 = vsyncpa [#allocation6 + $0x1], 1 }
 0x127   :  { %966 = vsyncpa [#allocation4], 1 }
 0x128   :  { %968 = vsyncpa [#allocation4 + $0x1], 1 }
 0x129   :  { %969 = vsyncpa [#allocation9], 1 }
 0x12a   :  { %971 = vsyncpa [#allocation9 + $0x1], 1 }

</bundles_post_ra>
